<compile_context>
chip_gen: v7x
topology: tpu7x:2x2x1
jax: 0.10.0
libtpu: 0.0.40
codegen_flags: <defaults>
</compile_context>

<pallas_src>
import jax
import jax.numpy as jnp
from jax.experimental import pallas as pl
from jax.experimental.pallas import tpu as pltpu


def _dsf_kernel(l_ref, v_ref, wl_ref, wv_ref, b_ref, o_ref):
    l = l_ref[...].astype(jnp.float32)          # (BR, E)
    v = v_ref[...].astype(jnp.float32)          # (BR, E)
    # logits = cat(l, v) @ W  ==  l @ W_l + v @ W_v   (no in-kernel concat)
    logits = (jnp.dot(l, wl_ref[...], preferred_element_type=jnp.float32)
              + jnp.dot(v, wv_ref[...], preferred_element_type=jnp.float32)
              + b_ref[...])
    att = jax.nn.sigmoid(logits)                # EUP transcendental
    o_ref[...] = (att * v + (1.0 - att) * l).astype(o_ref.dtype)


def _round_up(x, m):
    return (x + m - 1) // m * m


def dsf_forward(l_feature, v_feature, w_att, b_att, *, block_rows=None):
    """DSF gated fusion.

    l_feature, v_feature: (T, N, E)
    w_att: (2E, E) pre-transposed weight (x @ w_att); first E rows act on
           l_feature, last E on v_feature (matches torch.cat order).
    b_att: (1, E)
    Returns (T, N, E).
    """
    T, N, E = l_feature.shape
    rows = T * N

    if block_rows is None:
        if rows <= 8:
            block_rows = 8
        elif rows <= 1024:
            # aim for >= 2 parallel grid blocks (v7x has 2 TCs/chip)
            block_rows = _round_up((rows + 1) // 2, 8)
        else:
            block_rows = 512
    rows_pad = _round_up(rows, block_rows)
    grid = (rows_pad // block_rows,)

    # flatten to rows -- pure reshape of contiguous (T, N, E), no transpose
    lf = l_feature.reshape(rows, E)
    vf = v_feature.reshape(rows, E)
    if rows_pad != rows:
        pad = ((0, rows_pad - rows), (0, 0))
        lf = jnp.pad(lf, pad)
        vf = jnp.pad(vf, pad)

    wl = w_att[:E]              # (E, E)
    wv = w_att[E:]              # (E, E)

    row_spec = pl.BlockSpec((block_rows, E), lambda i: (i, 0))
    full = lambda shape: pl.BlockSpec(shape, lambda i: (0, 0))

    cost = pl.CostEstimate(
        flops=2 * rows_pad * E * (2 * E) + 4 * rows_pad * E,
        transcendentals=rows_pad * E,
        bytes_accessed=(3 * rows_pad * E + 2 * E * E + E) * 4,
    )

    out = pl.pallas_call(
        _dsf_kernel,
        out_shape=jax.ShapeDtypeStruct((rows_pad, E), l_feature.dtype),
        grid_spec=pltpu.PrefetchScalarGridSpec(
            num_scalar_prefetch=0,
            grid=grid,
            in_specs=[row_spec, row_spec,
                      full((E, E)), full((E, E)), full((1, E))],
            out_specs=pl.BlockSpec((block_rows, E), lambda i: (i, 0)),
        ),
        compiler_params=pltpu.CompilerParams(
            dimension_semantics=("parallel",)),
        cost_estimate=cost,
    )(lf, vf, wl, wv, b_att)

    return out[:rows].reshape(T, N, E)


def dsf_reference(l_feature, v_feature, w_att, b_att):
    """Pure-JAX reference mirroring the PyTorch DSF.forward."""
    f = jnp.concatenate([l_feature, v_feature], axis=2)          # (T, N, 2E)
    f_att = jax.nn.sigmoid(jnp.einsum("tnf,fe->tne", f, w_att) + b_att[0])
    return f_att * v_feature + (1.0 - f_att) * l_feature


def make_params(key, d_model, fusion_num=2):
    E = d_model
    kw, kb = jax.random.split(key)
    scale = 1.0 / jnp.sqrt(float(fusion_num * E))
    # stored pre-transposed: x @ w_att, shape (fusion_num*E, E)
    w_att = jax.random.normal(kw, (fusion_num * E, E), jnp.float32) * scale
    b_att = jax.random.normal(kb, (1, E), jnp.float32) * 0.01
    return w_att, b_att


if __name__ == "__main__":
    d_model = 32
    fusion_num = 2
    T, N = 8, 2

    root = jax.random.PRNGKey(0)
    kl, kv, kp = jax.random.split(root, 3)
    l_feature = jax.random.normal(kl, (T, N, d_model), jnp.float32)
    v_feature = jax.random.normal(kv, (T, N, d_model), jnp.float32)
    w_att, b_att = make_params(kp, d_model, fusion_num)

    out = dsf_forward(l_feature, v_feature, w_att, b_att)
    out = jax.block_until_ready(out)

    ref = dsf_reference(l_feature, v_feature, w_att, b_att)
    assert out.shape == (T, N, d_model)
    assert jnp.allclose(out, ref, atol=1e-4, rtol=1e-4), "mismatch vs reference"

    print("KERNEL_OK")
</pallas_src>

<mosaic_0001>
module attributes {stable_mosaic.version = 11 : i64} {
  func.func @_dsf_kernel(%arg0: i32, %arg1: memref<8x32xf32, #tpu.memory_space<vmem>>, %arg2: memref<8x32xf32, #tpu.memory_space<vmem>>, %arg3: memref<32x32xf32, #tpu.memory_space<vmem>>, %arg4: memref<32x32xf32, #tpu.memory_space<vmem>>, %arg5: memref<1x32xf32, #tpu.memory_space<vmem>>, %arg6: memref<8x32xf32, #tpu.memory_space<vmem>>) attributes {dimension_semantics = [#tpu.dimension_semantics<parallel>], iteration_bounds = array<i64: 2>, scalar_prefetch = 0 : i64, scratch_operands = 0 : i64, tpu.core_type = #tpu.core_type<tc>, window_params = [{transform_indices = @transform_0, window_bounds = array<i64: 8, 32>}, {transform_indices = @transform_1, window_bounds = array<i64: 8, 32>}, {pipeline_mode = #tpu.pipeline_mode<synchronous>, transform_indices = @transform_2, window_bounds = array<i64: 32, 32>}, {pipeline_mode = #tpu.pipeline_mode<synchronous>, transform_indices = @transform_3, window_bounds = array<i64: 32, 32>}, {pipeline_mode = #tpu.pipeline_mode<synchronous>, transform_indices = @transform_4, window_bounds = array<i64: 1, 32>}, {transform_indices = @transform_5, window_bounds = array<i64: 8, 32>}]} {
    %c0 = arith.constant 0 : index
    %c0_0 = arith.constant 0 : index
    %0 = vector.load %arg1[%c0, %c0_0] : memref<8x32xf32, #tpu.memory_space<vmem>>, vector<8x32xf32>
    %c0_1 = arith.constant 0 : index
    %c0_2 = arith.constant 0 : index
    %1 = vector.load %arg2[%c0_1, %c0_2] : memref<8x32xf32, #tpu.memory_space<vmem>>, vector<8x32xf32>
    %c0_3 = arith.constant 0 : index
    %c0_4 = arith.constant 0 : index
    %2 = vector.load %arg3[%c0_3, %c0_4] : memref<32x32xf32, #tpu.memory_space<vmem>>, vector<32x32xf32>
    %cst = arith.constant dense<0.000000e+00> : vector<8x32xf32>
    %3 = tpu.matmul %0, %2, %cst {dimension_numbers = #tpu.dot_dimension_numbers<[1], [0], [0], [1], [0, 0, 1, 1], [], []>} : vector<8x32xf32>, vector<32x32xf32>, vector<8x32xf32> -> vector<8x32xf32>
    %c0_5 = arith.constant 0 : index
    %c0_6 = arith.constant 0 : index
    %4 = vector.load %arg4[%c0_5, %c0_6] : memref<32x32xf32, #tpu.memory_space<vmem>>, vector<32x32xf32>
    %cst_7 = arith.constant dense<0.000000e+00> : vector<8x32xf32>
    %5 = tpu.matmul %1, %4, %cst_7 {dimension_numbers = #tpu.dot_dimension_numbers<[1], [0], [0], [1], [0, 0, 1, 1], [], []>} : vector<8x32xf32>, vector<32x32xf32>, vector<8x32xf32> -> vector<8x32xf32>
    %6 = arith.addf %3, %5 : vector<8x32xf32>
    %c0_8 = arith.constant 0 : index
    %c0_9 = arith.constant 0 : index
    %7 = vector.load %arg5[%c0_8, %c0_9] : memref<1x32xf32, #tpu.memory_space<vmem>>, vector<1x32xf32>
    %8 = vector.broadcast %7 : vector<1x32xf32> to vector<8x32xf32>
    %9 = arith.addf %6, %8 : vector<8x32xf32>
    %10 = arith.negf %9 : vector<8x32xf32>
    %11 = math.exp %10 : vector<8x32xf32>
    %cst_10 = arith.constant 1.000000e+00 : f32
    %12 = vector.broadcast %cst_10 : f32 to vector<8x32xf32>
    %13 = arith.addf %12, %11 : vector<8x32xf32>
    %14 = arith.divf %12, %13 : vector<8x32xf32>
    %15 = arith.mulf %14, %1 : vector<8x32xf32>
    %cst_11 = arith.constant 1.000000e+00 : f32
    %16 = vector.broadcast %cst_11 : f32 to vector<8x32xf32>
    %17 = arith.subf %16, %14 : vector<8x32xf32>
    %18 = arith.mulf %17, %0 : vector<8x32xf32>
    %19 = arith.addf %15, %18 : vector<8x32xf32>
    %c0_12 = arith.constant 0 : index
    %c0_13 = arith.constant 0 : index
    %20 = vector.load %arg6[%c0_12, %c0_13] : memref<8x32xf32, #tpu.memory_space<vmem>>, vector<8x32xf32>
    tpu.vector_store %arg6[%c0_12, %c0_13], %19 {strides = array<i32>} : memref<8x32xf32, #tpu.memory_space<vmem>>, vector<8x32xf32>,
    return
  }
  func.func @transform_0(%arg0: i32) -> (i32, i32) {
    %c0_i32 = arith.constant 0 : i32
    %c0_i32_0 = arith.constant 0 : i32
    return %arg0, %c0_i32 : i32, i32
  }
  func.func @transform_1(%arg0: i32) -> (i32, i32) {
    %c0_i32 = arith.constant 0 : i32
    %c0_i32_0 = arith.constant 0 : i32
    return %arg0, %c0_i32 : i32, i32
  }
  func.func @transform_2(%arg0: i32) -> (i32, i32) {
    %c0_i32 = arith.constant 0 : i32
    %c0_i32_0 = arith.constant 0 : i32
    %c0_i32_1 = arith.constant 0 : i32
    return %c0_i32, %c0_i32_0 : i32, i32
  }
  func.func @transform_3(%arg0: i32) -> (i32, i32) {
    %c0_i32 = arith.constant 0 : i32
    %c0_i32_0 = arith.constant 0 : i32
    %c0_i32_1 = arith.constant 0 : i32
    return %c0_i32, %c0_i32_0 : i32, i32
  }
  func.func @transform_4(%arg0: i32) -> (i32, i32) {
    %c0_i32 = arith.constant 0 : i32
    %c0_i32_0 = arith.constant 0 : i32
    %c0_i32_1 = arith.constant 0 : i32
    return %c0_i32, %c0_i32_0 : i32, i32
  }
  func.func @transform_5(%arg0: i32) -> (i32, i32) {
    %c0_i32 = arith.constant 0 : i32
    %c0_i32_0 = arith.constant 0 : i32
    return %arg0, %c0_i32 : i32, i32
  }
}

</mosaic_0001>

<bundles_post_ra>
// kernel: tpu_custom_call.1
= control target key start
LH: loop header
LB: loop body
LE: loop exit
PB: predicated region body
PF: predicated region fallthrough
CT: control target
= control target key end

     0   :  { %s1276_s0 = inlined_call_operand.hbm [shape: f32[16,32], index: 0, kind: input, shape index: {}]   ;;  %s1277_s1 = inlined_call_operand.hbm [shape: f32[16,32], index: 1, kind: input, shape index: {}]   ;;  %s1278_s2 = inlined_call_operand.hbm [shape: f32[32,32], index: 2, kind: input, shape index: {}]   ;;  %s1279_s3 = inlined_call_operand.hbm [shape: f32[32,32], index: 3, kind: input, shape index: {}]   ;;  %s1280_s4 = inlined_call_operand.vmem [shape: f32[1,32], index: 4, kind: input, shape index: {}]   ;;  %s1281_s5 = inlined_call_operand.hbm [shape: f32[16,32], index: 5, kind: output, shape index: {}]  }
   0x1   :  { %1286 = sst [smem:[#allocation16_spill]] %s1278_s2 }
   0x2   :  { %1287 = sst [smem:[#allocation17_spill]] %s1279_s3 }
   0x3   :  { %10 = vsyncpa [#allocation3], 0 }
   0x4   :  { %12 = vsyncpa [#allocation3 + $0x1], 0 }
   0x5   :  { %13 = vsyncpa [#allocation6], 0 }
   0x6   :  { %15 = vsyncpa [#allocation6 + $0x1], 0 }
   0x7   :  { %16 = vsyncpa [#allocation9], 0 }
   0x8   :  { %17 = vsyncpa [#allocation4], 0 }
   0x9   :  { %19 = vsyncpa [#allocation4 + $0x1], 0  ;;  %s992_s18 = smov 0   ;;  %s994_s19 = smov 0  }
   0xa   :  { %s996_s20 = smov 0   ;;  %s998_s21 = smov 0  }
   0xb LB: > { %s1013_s22 = sadd.s32 4294967295, %s950_s21   ;;  %s608_s23 = sadd.s32 4294967294, %s950_s21   ;;  %s950_s21 = sphi %s998_s21, %s1309_s21   ;;  %s946_s20 = sphi %s996_s20, %s1308_s20   ;;  %s942_s19 = sphi %s994_s19, %s1307_s19   ;;  %s938_s18 = sphi %s992_s18, %s1306_s18  }
   0xc   : > { %p45_p0 = scmp.ne.s32.totalorder %s942_s19, %s938_s18  ;;  %p1282_p1 = scmp.eq.s32.totalorder %s1013_s22, 0 }
   0xd   : > { %p164_p3 = scmp.eq.s32.totalorder %s608_s23, 1  ;;  %p609_p5 = scmp.ge.s32.totalorder %s950_s21, 1 }
   0xe   : > { %p1022_p4 = por %p1282_p1, %p45_p0  ;;  %p171_p7 = scmp.lt.s32.totalorder %s950_s21, 3 }
   0xf   : > { %p1027_p6 = por %p164_p3, %p45_p0  ;;  %s952_s27 = smov [#allocation7]  }
  0x10   : > { %s1288_s24 = scalar_select %p1022_p4, 1, 0 }
  0x11   : > { %s1289_s25 = scalar_select %p1027_p6, 1, 0 }
  0x12   : > { %p1032_p8 = pnand %p609_p5, %p171_p7  ;;  %s183_s28 = sshll.u32 %s952_s27, 4  ;;  %s1036_s28 = int_to_ptr.vmem [resolvable:$true] %s183_s28 }
  0x13   : > { %s953_s30 = smov [#allocation8]   ;;  %s1292_s2 = sld [smem:[#allocation16_spill]] }
  0x14   : > { %s1290_s26 = scalar_select %p1032_p8, 1, 0 }
  0x15   : > { %p689_p9 = pneg %p1032_p8  ;;  %s196_s6 = sshll.u32 %s953_s30, 4  ;;  %s1047_s6 = int_to_ptr.vmem [resolvable:$true] %s196_s6 }
  0x17   : > { %p1043_p11 = pnand %p689_p9, %p1282_p1 }
  0x19   : > { %s756_s9 = scalar_lea.hbm %s1292_s2, 512  ;;  %p758_p13 = pneg %p1043_p11 }
  0x1a   : > { %p757_p12 = scmp.ne.s32.totalorder %s1292_s2, %s756_s9  ;;  %p763_p5 = scmp.lt.u32.totalorder %s756_s9, %s1292_s2 }
  0x1c   : > { %p759_p0 = pnand %p758_p13, %p757_p12 }
  0x1e   : > { %p760_p3 = pneg %p759_p0 }
  0x20   : > { %p765_p7 = pnand %p763_p5, %p760_p3 }
  0x22   : > { %768 = shalt.err (!%p765_p7)
}
  0x23   : > { %s769_s14 = scalar_lea.vmem %s1036_s28, 512  ;;  %p777_p2 = scmp.lt.s32.totalorder %s1036_s28, %s1036_s28 }
  0x24   : > { %p770_p9 = scmp.ne.s32.totalorder %s1036_s28, %s769_s14  ;;  %p778_p12 = scmp.lt.s32.totalorder %s769_s14, %s769_s14 }
  0x26   : > { %p772_p10 = pnand %p770_p9, %p758_p13  ;;  %p779_p0 = por %p778_p12, %p777_p2 }
  0x28   : > { %p773_p1 = pneg %p772_p10 }
  0x2a   : > { %p780_p6 = pnand %p779_p0, %p773_p1 }
  0x2c   : > { %783 = shalt.err (!%p780_p6)
}
  0x2d   : > { %s954_s15 = smov 128   ;;  %s955_s16 = smov 8  }
  0x2e   : > { %692 = dma.hbm_to_vmem [thread:$0]  (!%p1043_p11), %s1292_s2, 512, %s1036_s28, [#allocation6], %s954_s15, %s954_s15, %s955_s16  }
  0x2f   : > { %s1293_s3 = sld [smem:[#allocation17_spill]] }
  0x35   : > { %s784_s7 = scalar_lea.hbm %s1293_s3, 512 }
  0x36   : > { %p785_p2 = scmp.ne.s32.totalorder %s1293_s3, %s784_s7  ;;  %p791_p10 = scmp.lt.u32.totalorder %s784_s7, %s1293_s3 }
  0x38   : > { %p787_p1 = pnand %p785_p2, %p758_p13 }
  0x3a   : > { %p788_p6 = pneg %p787_p1 }
  0x3c   : > { %p793_p3 = pnand %p791_p10, %p788_p6 }
  0x3e   : > { %796 = shalt.err (!%p793_p3)
}
  0x3f   : > { %s797_s28 = scalar_lea.vmem %s1047_s6, 512  ;;  %p805_p12 = scmp.lt.s32.totalorder %s1047_s6, %s1047_s6 }
  0x40   : > { %p798_p5 = scmp.ne.s32.totalorder %s1047_s6, %s797_s28  ;;  %p806_p0 = scmp.lt.s32.totalorder %s797_s28, %s797_s28 }
  0x42   : > { %p800_p7 = pnand %p798_p5, %p758_p13  ;;  %p807_p2 = por %p806_p0, %p805_p12 }
  0x44   : > { %p801_p9 = pneg %p800_p7 }
  0x46   : > { %p808_p1 = pnand %p807_p2, %p801_p9 }
  0x48   : > { %811 = shalt.err (!%p808_p1)
}
  0x49   : > { %695 = dma.hbm_to_vmem [thread:$0]  (!%p1043_p11), %s1293_s3, 512, %s1047_s6, [#allocation9], %s954_s15, %s954_s15, %s955_s16  }
  0x4a   : > { %s1102_s14 = sadd.s32 1, %s950_s21   ;;  %s32_s29 = sadd.s32 1, %s946_s20 }
  0x4b   : > { %s29_s17 = ssub.s32 %s950_s21, %s1102_s14  ;;  %p39_p13 = scmp.ne.s32.totalorder %s946_s20, %s942_s19 }
  0x4c   : > { %p30_p6 = scmp.eq.s32.totalorder %s29_s17, 0  ;;  %p40_p10 = scmp.eq.s32.totalorder %s950_s21, 0 }
  0x4d   : > { %p1294_p3 = scmp.eq.s32.totalorder %s1013_s22, 1  ;;  %p709_p7 = scmp.lt.s32.totalorder %s950_s21, 2 }
  0x4e   : > { %s1118_s27 = scalar_select %p30_p6, %s946_s20, %s32_s29  }
  0x4f   : > { %p1112_p5 = por %p1294_p3, %p39_p13  ;;  %p41_p9 = por %p40_p10, %p39_p13 }
  0x50   : > { %s213_s30 = sand.u32 1, %s946_s20   ;;  %s614_s15 = sshll.u32 %s950_s21, 7 }
  0x51   : > { %s1295_s23 = scalar_select %p1112_p5, 1, 0 }
  0x52   : > { %s1121_s6 = sshll.u32 %s213_s30, 3  ;;  %s1127_s8 = scalar_lea.hbm %s1276_s0, %s614_s15 }
  0x53   : > { %s217_s9 = scalar_lea.vmem [#allocation2], %s1121_s6  ;;  %p1132_p11 = pnand %p709_p7, %p41_p9 }
  0x54   : > { %s224_s10 = sshll.u32 %s217_s9, 4  ;;  %s1139_s13 = scalar_lea.hbm %s1277_s1, %s614_s15  ;;  %s1130_s10 = int_to_ptr.vmem [resolvable:$true] %s224_s10 }
  0x55   : > { %s231_s29 = sand.u32 1, %s950_s21   ;;  %s214_s17 = scalar_lea.sflag [#allocation3], %s213_s30 }
  0x56   : > { %s812_s16 = scalar_lea.hbm %s1127_s8, 128  ;;  %p814_p0 = pneg %p1132_p11 }
  0x57   : > { %p813_p12 = scmp.ne.s32.totalorder %s1127_s8, %s812_s16  ;;  %s817_s2 = scalar_lea.hbm %s1276_s0, 256 }
  0x58   : > { %p818_p13 = scmp.lt.u32.totalorder %s1127_s8, %s1276_s0  ;;  %p819_p6 = scmp.lt.u32.totalorder %s817_s2, %s812_s16 }
  0x59   : > { %p815_p2 = pnand %p814_p0, %p813_p12  ;;  %p821_p3 = scmp.lt.u32.totalorder %s812_s16, %s1127_s8 }
  0x5a   : > { %p820_p10 = por %p819_p6, %p818_p13 }
  0x5b   : > { %p816_p1 = pneg %p815_p2 }
  0x5c   : > { %p822_p7 = por %p821_p3, %p820_p10 }
  0x5e   : > { %p823_p9 = pnand %p822_p7, %p816_p1 }
  0x60   : > { %826 = shalt.err (!%p823_p9)
}
  0x61   : > { %s827_s30 = scalar_lea.vmem %s1130_s10, 128  ;;  %s956_s15 = smov [#allocation2]  }
  0x62   : > { %p828_p12 = scmp.ne.s32.totalorder %s1130_s10, %s827_s30  ;;  %s832_s12 = sshll.u32 %s956_s15, 4  ;;  %s833_s12 = int_to_ptr.vmem [resolvable:$false] %s832_s12 }
  0x63   : > { %s834_s3 = scalar_lea.vmem %s833_s12, 256  ;;  %p835_p4 = scmp.lt.s32.totalorder %s1130_s10, %s833_s12 }
  0x64   : > { %p830_p2 = pnand %p828_p12, %p814_p0  ;;  %p836_p13 = scmp.lt.s32.totalorder %s834_s3, %s827_s30 }
  0x66   : > { %p831_p5 = pneg %p830_p2  ;;  %p837_p6 = por %p836_p13, %p835_p4 }
  0x68   : > { %p838_p10 = pnand %p837_p6, %p831_p5 }
  0x6a   : > { %841 = shalt.err (!%p838_p10)
}
  0x6b   : > { %699 = dma.hbm_to_vmem [thread:$0]  (!%p1132_p11), %s1127_s8, 128, %s1130_s10, %s214_s17  }
  0x6c   : > { %s235_s2 = scalar_lea.vmem [#allocation5], %s1121_s6  ;;  %s232_s7 = scalar_lea.sflag [#allocation6], %s231_s29 }
  0x6d   : > { %s242_s16 = sshll.u32 %s235_s2, 4  ;;  %s842_s9 = scalar_lea.hbm %s1139_s13, 128  ;;  %s243_s16 = int_to_ptr.vmem [resolvable:$true] %s242_s16 }
  0x6e   : > { %p843_p4 = scmp.ne.s32.totalorder %s1139_s13, %s842_s9  ;;  %s847_s15 = scalar_lea.hbm %s1277_s1, 256 }
  0x6f   : > { %p848_p3 = scmp.lt.u32.totalorder %s1139_s13, %s1277_s1  ;;  %p849_p7 = scmp.lt.u32.totalorder %s847_s15, %s842_s9 }
  0x70   : > { %p845_p5 = pnand %p843_p4, %p814_p0  ;;  %p851_p12 = scmp.lt.u32.totalorder %s842_s9, %s1139_s13 }
  0x71   : > { %p850_p9 = por %p849_p7, %p848_p3 }
  0x72   : > { %p846_p1 = pneg %p845_p5 }
  0x73   : > { %p852_p2 = por %p851_p12, %p850_p9 }
  0x75   : > { %p853_p13 = pnand %p852_p2, %p846_p1 }
  0x77   : > { %856 = shalt.err (!%p853_p13)
}
  0x78   : > { %s857_s6 = scalar_lea.vmem %s243_s16, 128  ;;  %s957_s8 = smov [#allocation5]  }
  0x79   : > { %p858_p6 = scmp.ne.s32.totalorder %s243_s16, %s857_s6  ;;  %s862_s10 = sshll.u32 %s957_s8, 4  ;;  %s863_s10 = int_to_ptr.vmem [resolvable:$false] %s862_s10 }
  0x7a   : > { %s864_s29 = scalar_lea.vmem %s863_s10, 256  ;;  %p865_p5 = scmp.lt.s32.totalorder %s243_s16, %s863_s10 }
  0x7b   : > { %p860_p10 = pnand %p858_p6, %p814_p0  ;;  %p866_p8 = scmp.lt.s32.totalorder %s864_s29, %s857_s6 }
  0x7d   : > { %p861_p4 = pneg %p860_p10  ;;  %p867_p3 = por %p866_p8, %p865_p5 }
  0x7f   : > { %p868_p7 = pnand %p867_p3, %p861_p4 }
  0x81   : > { %871 = shalt.err (!%p868_p7)
}
  0x82   : > { %702 = dma.hbm_to_vmem [thread:$0]  (!%p1132_p11), %s1139_s13, 128, %s243_s16, %s232_s7  }
  0x83   : > { %p1297_p1 = scmp.ne.s32.totalorder %s1290_s26, 0 }
  0x84   : > { %s1192_s17 = sand.u32 (!%p1297_p1), 1, %s942_s19   ;;  %p1298_p8 = scmp.ne.s32.totalorder (!%p1297_p1), %s1288_s24, 0 }
  0x85   : > { %251 = sbr.rel (%p1297_p1) target bundleno = 425 (0x1a9), region = 40  ;;  %s1195_s2 = sshll.u32 (!%p1297_p1), %s1192_s17, 3 }
  0x86   : > { %s254_s9 = scalar_lea.sflag (!%p1297_p1), [#allocation3], %s1192_s17  ;;  %s257_s28 = scalar_lea.vmem (!%p1297_p1), [#allocation2], %s1195_s2 }
  0x8c   : > { %917 = dma.done.wait (%p1298_p8), %s254_s9, 128  }
  0x8d   : > { %919 = vsyncadd (%p1298_p8), %s254_s9, 4294967168  ;;  %s262_s26 = sand.u32 1, %s1013_s22   ;;  %s266_s13 = scalar_lea.vmem [#allocation5], %s1195_s2 }
  0x8e   : > { %s263_s11 = scalar_lea.sflag [#allocation6], %s262_s26 }
  0x8f   : > { %921 = dma.done.wait (%p1298_p8), %s263_s11, 128  }
  0x90   : > { %923 = vsyncadd (%p1298_p8), %s263_s11, 4294967168  ;;  %p1299_p11 = scmp.eq.s32.totalorder %s1013_s22, 0 }
  0x92   : > { %925 = dma.done.wait (%p1299_p11), [#allocation6], 512   ;;  %p1300_p0 = pmov %p1299_p11 }
  0x94   : > { %927 = vsyncadd (%p1300_p0), [#allocation6], 4294966784  ;;  %p1301_p9 = pmov %p1300_p0 }
  0x95   : > { %p1302_p12 = pmov %p1300_p0 }
  0x96   : > { %929 = dma.done.wait (%p1301_p9), [#allocation9], 512  }
  0x97   : > { %931 = vsyncadd (%p1302_p12), [#allocation9], 4294966784  ;;  %v958_v0 = vmov 0.0|0.0   ;;  %vm959_vm0 = vmmov 0   ;;  %v960_v1 = vmov 0.0   ;;  %v312_v2 = vld [vmem:[#allocation8] sm:$0xff] }
  0x98   : > { %663 = vmatprep.subr.bf16.mxu0 %v958_v0  ;;  %669 = vmatprep.subr.bf16.mxu1 %v958_v0  ;;  %v313_v3 = vld [vmem:[#allocation8 + $0x8] sm:$0xff]  ;;  %v308_v4 = vld [vmem:[#allocation7] sm:$0xff]  ;;  %v314_v7 = vld [vmem:[#allocation8 + $0x10] sm:$0xff]  ;;  %vm316_vm1 = vcmask 261120   ;;  %s628_s7 = sshll.u32 %s1013_s22, 7  ;;  %s305_s30 = scalar_lea.vmem [#allocation10], %s1195_s2 }
  0x99   : > { %649 = vmatprep.mubr.msk.f32.mxu0 %vm959_vm0, %v960_v1  ;;  %660 = vmatprep.mubr.msk.f32.mxu1 %vm959_vm0, %v960_v1  ;;  %v664_v5 = vpack.c.bf16 %v313_v3, %v312_v2  ;;  %v309_v6 = vld [vmem:[#allocation7 + $0x8] sm:$0xff]  ;;  %v315_v8 = vld [vmem:[#allocation8 + $0x18] sm:$0xff]  ;;  %v310_v10 = vld [vmem:[#allocation7 + $0x10] sm:$0xff]  ;;  %s496_s15 = sshll.u32 %s305_s30, 4  ;;  %s1231_s6 = scalar_lea.hbm %s1281_s5, %s628_s7  ;;  %s1233_s15 = int_to_ptr.vmem [resolvable:$true] %s496_s15 }
  0x9a   : > { %v670_v9 = vpack.c.bf16 %v309_v6, %v308_v4  ;;  %v311_v11 = vld [vmem:[#allocation7 + $0x18] sm:$0xff]  ;;  %v667_v12 = vpack.c.bf16 %v315_v8, %v314_v7  ;;  %v306_v15 = vld [vmem:[%s257_s28] sm:$0xff]  ;;  %s483_s8 = scalar_lea.sflag [#allocation4], %s1192_s17  ;;  %s872_s10 = scalar_lea.vmem %s1233_s15, 128 }
  0x9b   : > { %665 = vmatpush3.bf16.msra.mxu0 %v664_v5  ;;  %v673_v13 = vpack.c.bf16 %v311_v11, %v310_v10  ;;  %v307_v14 = vld [vmem:[%s266_s13] sm:$0xff]  ;;  %v625_v18 = vld [vmem:[%s1280_s4] ss:$0 sm:$0xff]  ;;  %p873_p2 = scmp.ne.s32.totalorder %s1233_s15, %s872_s10  ;;  %p1303_p13 = scmp.ne.s32.totalorder %s1295_s23, 0 }
  0x9c   : > { %671 = vmatpush3.bf16.msra.mxu1 %v670_v9  ;;  %666 = vmatprep.subr.bf16.mxu0 %v958_v0  ;;  %s961_s22 = smov [#allocation10]  }
  0x9d   : > { %672 = vmatprep.subr.bf16.mxu1 %v958_v0  ;;  %p874_p6 = pnand %p873_p2, %p1303_p13  ;;  %s876_s29 = sshll.u32 %s961_s22, 4  ;;  %s877_s29 = int_to_ptr.vmem [resolvable:$false] %s876_s29 }
  0x9e   : > { %s878_s2 = scalar_lea.vmem %s877_s29, 256  ;;  %p879_p4 = scmp.lt.s32.totalorder %s1233_s15, %s877_s29 }
  0x9f   : > { %668 = vmatpush3.bf16.msra.mxu0 %v667_v12  ;;  %p875_p10 = pneg %p874_p6  ;;  %p880_p5 = scmp.lt.s32.totalorder %s878_s2, %s872_s10 }
  0xa0   : > { %674 = vmatpush3.bf16.msra.mxu1 %v673_v13 }
  0xa1   : > { %p881_p3 = por %p880_p5, %p879_p4 }
  0xa2   : > { %650 = vmatmul.mubr.msk.f32.vlgmr.msra.gmra.mrb[0].mxu0 %vm316_vm1, %v307_v14 }
  0xa3   : > { %661 = vmatmul.mubr.msk.f32.vlgmr.msra.gmra.mrb[0].mxu1 %vm316_vm1, %v306_v15  ;;  %p882_p7 = pnand %p881_p3, %p875_p10 }
 0x175   : > { %v386_v16 = vpop.f32.mrb[0].mxu0 }
 0x176   : > { %v459_v17 = vpop.f32.mrb[0].mxu1  ;;  %v651_v19 = vpop.f32.mrb[1].mxu0 }
 0x177   : > { %v460_v20 = vadd.f32 %v459_v17, %v386_v16  ;;  %v662_v21 = vpop.f32.mrb[1].mxu1 }
 0x179   : > { %v470_v22 = vadd.f32 %v625_v18, %v460_v20 }
 0x17b   : > { %v626_v23 = vmul.f32 -1.442695, %v470_v22 }
 0x17d   : > { %752 = vpow2.f32 %v626_v23 }
 0x187   : > { %v753_v24 = vpop.eup %752 }
 0x188   : > { %v474_v25 = vadd.f32 1.0, %v753_v24 }
 0x18a   : > { %754 = vrcp.f32 %v474_v25 }
 0x194   : > { %v755_v26 = vpop.eup %754 }
 0x195   : > { %v478_v27 = vsub.f32 1.0, %v755_v26  ;;  %v477_v28 = vmul.f32 %v755_v26, %v307_v14 }
 0x197   : > { %v479_v29 = vmul.f32 %v478_v27, %v306_v15 }
 0x199   : > { %v480_v30 = vadd.f32 %v479_v29, %v477_v28 }
 0x19b   : > { %481 = vst.msk [vmem:[%s305_s30] sm:$0xff] %vm316_vm1, %v480_v30 }
 0x19c   : > { %885 = shalt.err (!%p882_p7)
}
 0x19d   : > { %s886_s17 = scalar_lea.hbm %s1231_s6, 128  ;;  %s890_s26 = scalar_lea.hbm %s1281_s5, 256 }
 0x19e   : > { %p887_p1 = scmp.ne.s32.totalorder %s1231_s6, %s886_s17  ;;  %p891_p0 = scmp.lt.u32.totalorder %s1231_s6, %s1281_s5 }
 0x19f   : > { %p892_p9 = scmp.lt.u32.totalorder %s890_s26, %s886_s17  ;;  %p894_p2 = scmp.lt.u32.totalorder %s886_s17, %s1231_s6 }
 0x1a0   : > { %p888_p8 = pnand %p887_p1, %p1303_p13 }
 0x1a1   : > { %p893_p12 = por %p892_p9, %p891_p0 }
 0x1a2   : > { %p889_p11 = pneg %p888_p8 }
 0x1a3   : > { %p895_p6 = por %p894_p2, %p893_p12 }
 0x1a5   : > { %p896_p10 = pnand %p895_p6, %p889_p11 }
 0x1a7   : > { %899 = shalt.err (!%p896_p10)
}
 0x1a8   : > { %687 = dma.vmem_to_hbm [thread:$0]  (%p1303_p13), %s1233_s15, 128, %s1231_s6, %s483_s8  }
 0x1a9 PF: > { %s508_s24 = sand.u32 1, %s938_s18   ;;  %p1304_p4 = scmp.ne.s32.totalorder %s1289_s25, 0 }
 0x1aa   : > { %p1305_p5 = scmp.ge.s32.totalorder %s950_s21, 2  ;;  %s509_s16 = scalar_lea.sflag [#allocation4], %s508_s24 }
 0x1ac   : > { %p704_p3 = pnand %p1305_p5, %p1304_p4 }
 0x1ae   : > { %933 = dma.done.wait (!%p704_p3), %s509_s16, 128  }
 0x1af   : > { %935 = vsyncadd (!%p704_p3), %s509_s16, 4294967168  ;;  %p22_p7 = scmp.ge.s32.totalorder %s1102_s14, 4   ;;  %s1306_s18 = smov %s942_s19 }
 0x1b0   : > { %s1307_s19 = smov %s946_s20  ;;  %s1308_s20 = smov %s1118_s27 }
 0x1b1   : > { %s1309_s21 = smov %s1102_s14  ;;  %24 = sbr.rel (!%p22_p7) target bundleno = 11 (0xb), region = 106 }
 0x1b8   :  { %514 = vsyncpa [#allocation3], 1 }
 0x1b9   :  { %516 = vsyncpa [#allocation3 + $0x1], 1 }
 0x1ba   :  { %517 = vsyncpa [#allocation6], 1 }
 0x1bb   :  { %519 = vsyncpa [#allocation6 + $0x1], 1 }
 0x1bc   :  { %520 = vsyncpa [#allocation9], 1 }
 0x1bd   :  { %521 = vsyncpa [#allocation4], 1 }
 0x1be   :  { %523 = vsyncpa [#allocation4 + $0x1], 1 }

</bundles_post_ra>
